<compile_context>
chip_gen: v7x
topology: tpu7x:2x2x1
jax: 0.10.0
libtpu: 0.0.40
codegen_flags: <defaults>
</compile_context>

<pallas_src>
import functools

import numpy as np
import jax
import jax.numpy as jnp
from jax.experimental import pallas as pl
from jax.experimental.pallas import tpu as pltpu


def _round_up(x, m):
    return ((x + m - 1) // m) * m


# ---------------------------------------------------------------------------
# Kernel
# ---------------------------------------------------------------------------
def _make_mlp_kernel(num_layers):
    """Fused MLP kernel: num_layers x (matmul + bias + ReLU) on one batch tile."""

    def kernel(x_ref, w_ref, b_ref, o_ref):
        # x_ref: [TB, P] bf16   w_ref: [L, P, P] bf16   b_ref: [L, 1, P] f32
        # o_ref: [TB, P] bf16
        h = x_ref[...]                                   # bf16, feeds MXU directly
        # Static unroll: L is tiny (3). For deep MLPs switch to
        # lax.fori_loop over w_ref[i] / b_ref[i] to bound live ranges.
        for i in range(num_layers):
            acc = jnp.dot(h, w_ref[i],                   # bf16 x bf16 -> f32 acc
                          preferred_element_type=jnp.float32) + b_ref[i]
            acc = jnp.maximum(acc, 0.0)                  # activation after EVERY Linear
            h = acc.astype(jnp.bfloat16)                 # next layer's MXU input / output
            # TODO(synk): nn.Dropout is identity in eval mode; training-mode dropout
            # (pltpu.prng_seed/prng_random_bits masking + 1/(1-p) rescale) omitted.
        o_ref[...] = h

    return kernel


# ---------------------------------------------------------------------------
# One-time parameter packing (hoisted out of the per-call path)
# ---------------------------------------------------------------------------
def pack_params(params, matmul_dtype=jnp.bfloat16):
    """Pack L x (W,b) into one bf16 weight slab + one f32 bias slab (done ONCE).

    Args:
      params: list of (W, b) with W: [in_i, out_i], b: [1, out_i] (float32).
    Returns:
      w_packed [L,P,P] bf16, b_packed [L,1,P] f32, dims list, P (padded width).
    """
    dims = [params[0][0].shape[0]] + [W.shape[1] for (W, _) in params]
    P = _round_up(max(dims), 128)          # one lane-dense width (all dims <= 128 here)
    L = len(params)

    # Build in numpy: no per-call XLA scatter ops, single device transfer each.
    w_np = np.zeros((L, P, P), dtype=np.float32)
    b_np = np.zeros((L, 1, P), dtype=np.float32)
    for i, (W, b) in enumerate(params):
        fi, fo = W.shape
        w_np[i, :fi, :fo] = np.asarray(W, dtype=np.float32)
        b_np[i, 0, :fo] = np.asarray(b, dtype=np.float32).reshape(fo)

    w_packed = jnp.asarray(w_np, dtype=matmul_dtype)
    b_packed = jnp.asarray(b_np, dtype=jnp.float32)
    return w_packed, b_packed, dims, P


# ---------------------------------------------------------------------------
# Forward (hot path): pad -> fused pallas kernel -> slice
# ---------------------------------------------------------------------------
@functools.partial(jax.jit, static_argnames=("out_dim", "batch_tile"))
def mlp_forward(x, w_packed, b_packed, *, out_dim, batch_tile=1024):
    """Fused MLP forward.

    Args:
      x:         [B, f_in] input (any float dtype; computed in bf16/f32-acc).
      w_packed:  [L, P, P] bf16 packed weights (from pack_params).
      b_packed:  [L, 1, P] f32 packed biases.
      out_dim:   true output feature dim (static).
    Returns:
      [B, out_dim] array in x.dtype.
    """
    B, f_in = x.shape
    L, P, _ = w_packed.shape

    # Batch tiling: sublane-aligned, capped at batch_tile, rebalanced so the last
    # tile isn't nearly empty. With batch_tile=1024, B > 1024 gives >= 2 parallel
    # tiles (dual-TC sharding on v7x).
    B_al = _round_up(max(B, 8), 8)
    TB0 = min(batch_tile, B_al)
    n_tiles = (B_al + TB0 - 1) // TB0
    TB = _round_up((B_al + n_tiles - 1) // n_tiles, 8)
    B_pad = TB * n_tiles

    # bf16 input slab (padded rows/cols are zero: zero weight rows + zero bias
    # padding => padded feature columns stay exactly 0 through every ReLU layer).
    x_pad = jnp.pad(x.astype(jnp.bfloat16), ((0, B_pad - B), (0, P - f_in)))

    # Advisory cost: what the kernel actually does (padded MXU work, bf16 slabs).
    flops = 2 * B_pad * L * P * P
    bytes_accessed = (x_pad.size * 2            # bf16 in
                      + w_packed.size * 2       # bf16 weights
                      + b_packed.size * 4       # f32 biases
                      + B_pad * P * 2)          # bf16 out

    out_padded = pl.pallas_call(
        _make_mlp_kernel(L),
        out_shape=jax.ShapeDtypeStruct((B_pad, P), jnp.bfloat16),
        grid=(B_pad // TB,),
        in_specs=[
            # Batch tile marches over the grid axis (lane-dense (TB,128) blocks).
            pl.BlockSpec((TB, P), lambda i: (i, 0)),
            # Weights / biases: full-array, grid-invariant => VMEM-resident.
            pl.BlockSpec((L, P, P), lambda i: (0, 0, 0)),
            pl.BlockSpec((L, 1, P), lambda i: (0, 0, 0)),
        ],
        out_specs=pl.BlockSpec((TB, P), lambda i: (i, 0)),
        compiler_params=pltpu.CompilerParams(
            dimension_semantics=("parallel",),   # shard batch tiles across TCs (v7x)
        ),
        cost_estimate=pl.CostEstimate(
            flops=flops, transcendentals=0, bytes_accessed=bytes_accessed),
    )(x_pad, w_packed, b_packed)

    return out_padded[:B, :out_dim].astype(x.dtype)


# ---------------------------------------------------------------------------
# Init / reference
# ---------------------------------------------------------------------------
def init_params(key, size_layers):
    """Deterministic init mimicking torch.nn.Linear's U(-1/sqrt(fan_in), +1/sqrt(fan_in))."""
    params = []
    for i in range(len(size_layers) - 1):
        fan_in, fan_out = size_layers[i], size_layers[i + 1]
        key, kw, kb = jax.random.split(key, 3)
        bound = 1.0 / jnp.sqrt(jnp.float32(fan_in))
        W = jax.random.uniform(kw, (fan_in, fan_out), jnp.float32, -bound, bound)
        b = jax.random.uniform(kb, (1, fan_out), jnp.float32, -bound, bound)
        params.append((W, b))
    return params


def reference_forward(x, params, matmul_dtype=None):
    """Pure-JAX reference. matmul_dtype=None -> full f32; bf16 -> matches kernel rounding."""
    h = x.astype(jnp.float32)
    for W, b in params:
        if matmul_dtype is not None:
            hm, Wm = h.astype(matmul_dtype), W.astype(matmul_dtype)
        else:
            hm, Wm = h, W
        h = jnp.maximum(
            jnp.dot(hm, Wm, preferred_element_type=jnp.float32) + b.reshape(1, -1), 0.0)
    return h


if __name__ == "__main__":
    # Module config (synthetic, deterministic):
    #   size_layers    = [32, 64, 64, 16]
    #   dropout_layers = [0.5, 0.0, 0.5]   (identity at inference)
    #   activation     = ReLU
    size_layers = [32, 64, 64, 16]
    batch = 8

    key = jax.random.PRNGKey(0)
    key, kx = jax.random.split(key)
    x = jax.random.normal(kx, (batch, size_layers[0]), jnp.float32)
    params = init_params(key, size_layers)

    # One-time packing, hoisted out of the forward path.
    w_packed, b_packed, dims, P = pack_params(params)
    out_dim = dims[-1]

    out = mlp_forward(x, w_packed, b_packed, out_dim=out_dim)
    out = jax.block_until_ready(out)
    assert out.shape == (batch, out_dim)

    # Tight check vs a reference with matching bf16 matmul-input + bf16 output
    # rounding, plus a loose sanity check against the pure-f32 reference.
    ref_bf16 = reference_forward(x, params, matmul_dtype=jnp.bfloat16)
    ref_bf16 = ref_bf16.astype(jnp.bfloat16).astype(jnp.float32)
    ref_f32 = reference_forward(x, params)

    assert jnp.allclose(out, ref_bf16, atol=1e-2, rtol=1e-2), "mismatch vs bf16-matched reference"
    assert jnp.allclose(out, ref_f32, atol=5e-2, rtol=5e-2), "mismatch vs f32 reference"

    print("KERNEL_OK")
</pallas_src>

<mosaic_0001>
module attributes {stable_mosaic.version = 11 : i64} {
  func.func @kernel(%arg0: i32, %arg1: memref<8x128xbf16, #tpu.memory_space<vmem>>, %arg2: memref<3x128x128xbf16, #tpu.memory_space<vmem>>, %arg3: memref<3x1x128xf32, #tpu.memory_space<vmem>>, %arg4: memref<8x128xbf16, #tpu.memory_space<vmem>>) attributes {dimension_semantics = [#tpu.dimension_semantics<parallel>], iteration_bounds = array<i64: 1>, scalar_prefetch = 0 : i64, scratch_operands = 0 : i64, tpu.core_type = #tpu.core_type<tc>, window_params = [{transform_indices = @transform_0, window_bounds = array<i64: 8, 128>}, {pipeline_mode = #tpu.pipeline_mode<synchronous>, transform_indices = @transform_1, window_bounds = array<i64: 3, 128, 128>}, {pipeline_mode = #tpu.pipeline_mode<synchronous>, transform_indices = @transform_2, window_bounds = array<i64: 3, 1, 128>}, {transform_indices = @transform_3, window_bounds = array<i64: 8, 128>}]} {
    %c0 = arith.constant 0 : index
    %c0_0 = arith.constant 0 : index
    %0 = vector.load %arg1[%c0, %c0_0] : memref<8x128xbf16, #tpu.memory_space<vmem>>, vector<8x128xbf16>
    %c0_1 = arith.constant 0 : index
    %c0_2 = arith.constant 0 : index
    %c0_3 = arith.constant 0 : index
    %1 = vector.load %arg2[%c0_1, %c0_2, %c0_3] : memref<3x128x128xbf16, #tpu.memory_space<vmem>>, vector<1x128x128xbf16>
    %2 = vector.shape_cast %1 : vector<1x128x128xbf16> to vector<128x128xbf16>
    %cst = arith.constant dense<0.000000e+00> : vector<8x128xf32>
    %3 = tpu.matmul %0, %2, %cst {dimension_numbers = #tpu.dot_dimension_numbers<[1], [0], [0], [1], [0, 0, 1, 1], [], []>} : vector<8x128xbf16>, vector<128x128xbf16>, vector<8x128xf32> -> vector<8x128xf32>
    %c0_4 = arith.constant 0 : index
    %c0_5 = arith.constant 0 : index
    %c0_6 = arith.constant 0 : index
    %4 = vector.load %arg3[%c0_4, %c0_5, %c0_6] : memref<3x1x128xf32, #tpu.memory_space<vmem>>, vector<1x1x128xf32>
    %5 = vector.shape_cast %4 : vector<1x1x128xf32> to vector<1x128xf32>
    %6 = vector.broadcast %5 : vector<1x128xf32> to vector<8x128xf32>
    %7 = arith.addf %3, %6 : vector<8x128xf32>
    %cst_7 = arith.constant 0.000000e+00 : f32
    %8 = vector.broadcast %cst_7 : f32 to vector<8x128xf32>
    %9 = arith.maximumf %7, %8 : vector<8x128xf32>
    %10 = arith.truncf %9 : vector<8x128xf32> to vector<8x128xbf16>
    %c1 = arith.constant 1 : index
    %c0_8 = arith.constant 0 : index
    %c0_9 = arith.constant 0 : index
    %11 = vector.load %arg2[%c1, %c0_8, %c0_9] : memref<3x128x128xbf16, #tpu.memory_space<vmem>>, vector<1x128x128xbf16>
    %12 = vector.shape_cast %11 : vector<1x128x128xbf16> to vector<128x128xbf16>
    %cst_10 = arith.constant dense<0.000000e+00> : vector<8x128xf32>
    %13 = tpu.matmul %10, %12, %cst_10 {dimension_numbers = #tpu.dot_dimension_numbers<[1], [0], [0], [1], [0, 0, 1, 1], [], []>} : vector<8x128xbf16>, vector<128x128xbf16>, vector<8x128xf32> -> vector<8x128xf32>
    %c1_11 = arith.constant 1 : index
    %c0_12 = arith.constant 0 : index
    %c0_13 = arith.constant 0 : index
    %14 = vector.load %arg3[%c1_11, %c0_12, %c0_13] : memref<3x1x128xf32, #tpu.memory_space<vmem>>, vector<1x1x128xf32>
    %15 = vector.shape_cast %14 : vector<1x1x128xf32> to vector<1x128xf32>
    %16 = vector.broadcast %15 : vector<1x128xf32> to vector<8x128xf32>
    %17 = arith.addf %13, %16 : vector<8x128xf32>
    %cst_14 = arith.constant 0.000000e+00 : f32
    %18 = vector.broadcast %cst_14 : f32 to vector<8x128xf32>
    %19 = arith.maximumf %17, %18 : vector<8x128xf32>
    %20 = arith.truncf %19 : vector<8x128xf32> to vector<8x128xbf16>
    %c2 = arith.constant 2 : index
    %c0_15 = arith.constant 0 : index
    %c0_16 = arith.constant 0 : index
    %21 = vector.load %arg2[%c2, %c0_15, %c0_16] : memref<3x128x128xbf16, #tpu.memory_space<vmem>>, vector<1x128x128xbf16>
    %22 = vector.shape_cast %21 : vector<1x128x128xbf16> to vector<128x128xbf16>
    %cst_17 = arith.constant dense<0.000000e+00> : vector<8x128xf32>
    %23 = tpu.matmul %20, %22, %cst_17 {dimension_numbers = #tpu.dot_dimension_numbers<[1], [0], [0], [1], [0, 0, 1, 1], [], []>} : vector<8x128xbf16>, vector<128x128xbf16>, vector<8x128xf32> -> vector<8x128xf32>
    %c2_18 = arith.constant 2 : index
    %c0_19 = arith.constant 0 : index
    %c0_20 = arith.constant 0 : index
    %24 = vector.load %arg3[%c2_18, %c0_19, %c0_20] : memref<3x1x128xf32, #tpu.memory_space<vmem>>, vector<1x1x128xf32>
    %25 = vector.shape_cast %24 : vector<1x1x128xf32> to vector<1x128xf32>
    %26 = vector.broadcast %25 : vector<1x128xf32> to vector<8x128xf32>
    %27 = arith.addf %23, %26 : vector<8x128xf32>
    %cst_21 = arith.constant 0.000000e+00 : f32
    %28 = vector.broadcast %cst_21 : f32 to vector<8x128xf32>
    %29 = arith.maximumf %27, %28 : vector<8x128xf32>
    %30 = arith.truncf %29 : vector<8x128xf32> to vector<8x128xbf16>
    %c0_22 = arith.constant 0 : index
    %c0_23 = arith.constant 0 : index
    %31 = vector.load %arg4[%c0_22, %c0_23] : memref<8x128xbf16, #tpu.memory_space<vmem>>, vector<8x128xbf16>
    tpu.vector_store %arg4[%c0_22, %c0_23], %30 {strides = array<i32>} : memref<8x128xbf16, #tpu.memory_space<vmem>>, vector<8x128xbf16>,
    return
  }
  func.func @transform_0(%arg0: i32) -> (i32, i32) {
    %c0_i32 = arith.constant 0 : i32
    %c0_i32_0 = arith.constant 0 : i32
    return %arg0, %c0_i32 : i32, i32
  }
  func.func @transform_1(%arg0: i32) -> (i32, i32, i32) {
    %c0_i32 = arith.constant 0 : i32
    %c0_i32_0 = arith.constant 0 : i32
    %c0_i32_1 = arith.constant 0 : i32
    %c0_i32_2 = arith.constant 0 : i32
    return %c0_i32, %c0_i32_0, %c0_i32_1 : i32, i32, i32
  }
  func.func @transform_2(%arg0: i32) -> (i32, i32, i32) {
    %c0_i32 = arith.constant 0 : i32
    %c0_i32_0 = arith.constant 0 : i32
    %c0_i32_1 = arith.constant 0 : i32
    %c0_i32_2 = arith.constant 0 : i32
    return %c0_i32, %c0_i32_0, %c0_i32_1 : i32, i32, i32
  }
  func.func @transform_3(%arg0: i32) -> (i32, i32) {
    %c0_i32 = arith.constant 0 : i32
    %c0_i32_0 = arith.constant 0 : i32
    return %arg0, %c0_i32 : i32, i32
  }
}

</mosaic_0001>

<bundles_post_ra>
// kernel: mlp_forward.1
= control target key start
LH: loop header
LB: loop body
LE: loop exit
PB: predicated region body
PF: predicated region fallthrough
CT: control target
= control target key end

     0   :  { %8 = vsyncpa [#allocation3], 0  ;;  %s548_s12 = smov [#allocation2]   ;;  %s630_s0 = inlined_call_operand.vmem [shape: bf16[8,128], index: 0, kind: input, shape index: {}]   ;;  %s631_s1 = inlined_call_operand.hbm [shape: bf16[3,128,128], index: 1, kind: input, shape index: {}]   ;;  %s632_s2 = inlined_call_operand.vmem [shape: f32[3,1,128], index: 2, kind: input, shape index: {}]   ;;  %s633_s3 = inlined_call_operand.vmem [shape: bf16[8,128], index: 3, kind: output, shape index: {}]  }
   0x1   :  { %s16_s13 = sshll.u32 %s548_s12, 4  ;;  %s524_s16 = scalar_lea.hbm %s631_s1, 3072  ;;  %s17_s13 = int_to_ptr.vmem [resolvable:$true] %s16_s13 }
   0x2   :  { %p525_p0 = scmp.ne.s32.totalorder %s631_s1, %s524_s16  ;;  %p528_p1 = scmp.lt.u32.totalorder %s524_s16, %s631_s1 }
   0x4   :  { %p530_p2 = pnand %p528_p1, %p525_p0 }
   0x6   :  { %533 = shalt.err (!%p530_p2)
}
   0x7   :  { %s534_s21 = scalar_lea.vmem %s17_s13, 3072  ;;  %p539_p4 = scmp.lt.s32.totalorder %s17_s13, %s17_s13 }
   0x8   :  { %p535_p3 = scmp.ne.s32.totalorder %s17_s13, %s534_s21  ;;  %p540_p5 = scmp.lt.s32.totalorder %s534_s21, %s534_s21 }
   0xa   :  { %p541_p6 = por %p540_p5, %p539_p4 }
   0xc   :  { %p542_p7 = pnand %p541_p6, %p535_p3 }
   0xe   :  { %545 = shalt.err (!%p542_p7)
}
   0xf   :  { %s549_s22 = smov 64   ;;  %s550_s23 = smov 4  }
  0x10   :  { %22 = dma.hbm_to_vmem [thread:$0]  %s631_s1, 3072, %s17_s13, [#allocation3], %s549_s22, %s549_s22, %s550_s23  }
  0x11   :  { %546 = dma.done.wait [#allocation3], 3072  }
  0x12   :  { %547 = vsyncadd [#allocation3], 4294964224  ;;  %v551_v0 = vmov 0.0   ;;  %vm552_vm0 = vmmov 0   ;;  %v500_v1 = vld [vmem:[#allocation2] sm:$0xff]   ;;  %v501_v2 = vld [vmem:[#allocation2 + $0x8] sm:$0xff]  }
  0x13   :  { %435 = vmatprep.subr.bf16.mxu0 %v551_v0  ;;  %451 = vmatprep.mubr.msk.bf16.mxu0 %vm552_vm0, %v551_v0  ;;  %v502_v3 = vld [vmem:[#allocation2 + $0x10] sm:$0xff]   ;;  %v508_v4 = vld [vmem:[#allocation2 + $0x40] sm:$0xff]   ;;  %v503_v5 = vld [vmem:[#allocation2 + $0x18] sm:$0xff]  }
  0x14   :  { %455 = vmatprep.subr.bf16.mxu1 %v551_v0  ;;  %471 = vmatprep.mubr.msk.bf16.mxu1 %vm552_vm0, %v551_v0  ;;  %v509_v6 = vld [vmem:[#allocation2 + $0x48] sm:$0xff]   ;;  %v504_v7 = vld [vmem:[#allocation2 + $0x20] sm:$0xff]   ;;  %v510_v8 = vld [vmem:[#allocation2 + $0x50] sm:$0xff]  }
  0x15   :  { %436 = vmatpush3.bf16.msra.mxu0 %v500_v1  ;;  %456 = vmatpush3.bf16.msra.mxu1 %v508_v4  ;;  %v505_v9 = vld [vmem:[#allocation2 + $0x28] sm:$0xff]   ;;  %v511_v10 = vld [vmem:[#allocation2 + $0x58] sm:$0xff]   ;;  %v506_v11 = vld [vmem:[#allocation2 + $0x30] sm:$0xff]  }
  0x16   :  { %437 = vmatprep.subr.bf16.mxu0 %v551_v0  ;;  %457 = vmatprep.subr.bf16.mxu1 %v551_v0  ;;  %v512_v12 = vld [vmem:[#allocation2 + $0x60] sm:$0xff]   ;;  %v507_v13 = vld [vmem:[#allocation2 + $0x38] sm:$0xff]   ;;  %v513_v14 = vld [vmem:[#allocation2 + $0x68] sm:$0xff]  }
  0x17   :  { %v29_v15 = vld [vmem:[%s630_s0] sm:$0xf]  ;;  %v514_v16 = vld [vmem:[#allocation2 + $0x70] sm:$0xff]   ;;  %v515_v17 = vld [vmem:[#allocation2 + $0x78] sm:$0xff]  }
  0x18   :  { %v516_v18 = vld [vmem:[#allocation2 + $0x80] sm:$0xff]   ;;  %v517_v19 = vld [vmem:[#allocation2 + $0x88] sm:$0xff]   ;;  %v518_v20 = vld [vmem:[#allocation2 + $0x90] sm:$0xff]  }
  0x19   :  { %438 = vmatpush3.bf16.msra.mxu0 %v501_v2  ;;  %458 = vmatpush3.bf16.msra.mxu1 %v509_v6  ;;  %v519_v21 = vld [vmem:[#allocation2 + $0x98] sm:$0xff]   ;;  %v520_v22 = vld [vmem:[#allocation2 + $0xa0] sm:$0xff]   ;;  %v521_v23 = vld [vmem:[#allocation2 + $0xa8] sm:$0xff]  }
  0x1a   :  { %439 = vmatprep.subr.bf16.mxu0 %v551_v0  ;;  %459 = vmatprep.subr.bf16.mxu1 %v551_v0  ;;  %v379_v24 = vld [vmem:[%s632_s2] ss:$0 sm:$0xff]  ;;  %v522_v32 = vld [vmem:[#allocation2 + $0xb0] sm:$0xff]   ;;  %v523_v33 = vld [vmem:[#allocation2 + $0xb8] sm:$0xff]  }
  0x1b   :  { %v389_v34 = vld [vmem:[%s632_s2 + $0x1] ss:$0 sm:$0xff]  ;;  %v399_v42 = vld [vmem:[%s632_s2 + $0x2] ss:$0 sm:$0xff] }
  0x1d   :  { %440 = vmatpush3.bf16.msra.mxu0 %v502_v3  ;;  %460 = vmatpush3.bf16.msra.mxu1 %v510_v8 }
  0x1e   :  { %441 = vmatprep.subr.bf16.mxu0 %v551_v0  ;;  %461 = vmatprep.subr.bf16.mxu1 %v551_v0 }
  0x21   :  { %442 = vmatpush3.bf16.msra.mxu0 %v503_v5  ;;  %462 = vmatpush3.bf16.msra.mxu1 %v511_v10 }
  0x22   :  { %443 = vmatprep.subr.bf16.mxu0 %v551_v0  ;;  %463 = vmatprep.subr.bf16.mxu1 %v551_v0 }
  0x25   :  { %444 = vmatpush3.bf16.msra.mxu0 %v504_v7  ;;  %464 = vmatpush3.bf16.msra.mxu1 %v512_v12 }
  0x26   :  { %445 = vmatprep.subr.bf16.mxu0 %v551_v0  ;;  %465 = vmatprep.subr.bf16.mxu1 %v551_v0 }
  0x29   :  { %446 = vmatpush3.bf16.msra.mxu0 %v505_v9  ;;  %466 = vmatpush3.bf16.msra.mxu1 %v513_v14 }
  0x2a   :  { %447 = vmatprep.subr.bf16.mxu0 %v551_v0  ;;  %467 = vmatprep.subr.bf16.mxu1 %v551_v0 }
  0x2d   :  { %448 = vmatpush3.bf16.msra.mxu0 %v506_v11  ;;  %468 = vmatpush3.bf16.msra.mxu1 %v514_v16 }
  0x2e   :  { %449 = vmatprep.subr.bf16.mxu0 %v551_v0  ;;  %469 = vmatprep.subr.bf16.mxu1 %v551_v0 }
  0x31   :  { %450 = vmatpush3.bf16.msra.mxu0 %v507_v13  ;;  %470 = vmatpush3.bf16.msra.mxu1 %v515_v17 }
  0x32   :  { %475 = vmatprep.subr.bf16.mxu0 %v551_v0 }
  0x34   :  { %452 = vmatmul.mubr.bf16.vlgmr.msra.gmra.mrb[0].mxu0 %v29_v15 }
  0x35   :  { %491 = vmatprep.mubr.msk.bf16.mxu0 %vm552_vm0, %v551_v0  ;;  %476 = vmatpush3.bf16.msra.mxu0 %v516_v18 }
  0x36   :  { %477 = vmatprep.subr.bf16.mxu0 %v551_v0 }
  0x39   :  { %478 = vmatpush3.bf16.msra.mxu0 %v517_v19 }
  0x3a   :  { %479 = vmatprep.subr.bf16.mxu0 %v551_v0 }
  0x3d   :  { %480 = vmatpush3.bf16.msra.mxu0 %v518_v20 }
  0x3e   :  { %481 = vmatprep.subr.bf16.mxu0 %v551_v0 }
  0x41   :  { %482 = vmatpush3.bf16.msra.mxu0 %v519_v21 }
  0x42   :  { %483 = vmatprep.subr.bf16.mxu0 %v551_v0 }
  0x45   :  { %484 = vmatpush3.bf16.msra.mxu0 %v520_v22 }
  0x46   :  { %485 = vmatprep.subr.bf16.mxu0 %v551_v0 }
  0x49   :  { %486 = vmatpush3.bf16.msra.mxu0 %v521_v23 }
  0x4a   :  { %487 = vmatprep.subr.bf16.mxu0 %v551_v0 }
  0x4d   :  { %488 = vmatpush3.bf16.msra.mxu0 %v522_v32 }
  0x4e   :  { %489 = vmatprep.subr.bf16.mxu0 %v551_v0 }
  0x51   :  { %490 = vmatpush3.bf16.msra.mxu0 %v523_v33 }
 0x107   :  { %v135_v25 = vpop.f32.mrb[0].mxu0 }
 0x108   :  { %v136_v26 = vadd.f32 %v379_v24, %v135_v25  ;;  %v453_v27 = vpop.f32.mrb[1].mxu0 }
 0x109   :  { %v138_v28 = vpop.f32.mrb[2].mxu0 }
 0x10a   :  { %v141_v29 = vmax.f32 %v136_v26, 0.0  ;;  %v454_v30 = vpop.f32.mrb[3].mxu0 }
 0x10c   :  { %v142_v31 = vpack.c.bf16 %v141_v29, %v141_v29 }
 0x10e   :  { %472 = vmatmul.mubr.bf16.vlgmr.msra.gmra.mrb[0].mxu1 %v142_v31 }
 0x1e1   :  { %v250_v35 = vpop.f32.mrb[0].mxu1 }
 0x1e2   :  { %v251_v36 = vadd.f32 %v389_v34, %v250_v35  ;;  %v473_v37 = vpop.f32.mrb[1].mxu1 }
 0x1e3   :  { %v253_v38 = vpop.f32.mrb[2].mxu1 }
 0x1e4   :  { %v256_v39 = vmax.f32 %v251_v36, 0.0  ;;  %v474_v40 = vpop.f32.mrb[3].mxu1 }
 0x1e6   :  { %v257_v41 = vpack.c.bf16 %v256_v39, %v256_v39 }
 0x1e8   :  { %492 = vmatmul.mubr.bf16.vlgmr.msra.gmra.mrb[4].mxu0 %v257_v41 }
 0x2bb   :  { %v365_v43 = vpop.f32.mrb[4].mxu0 }
 0x2bc   :  { %v366_v44 = vadd.f32 %v399_v42, %v365_v43  ;;  %v493_v45 = vpop.f32.mrb[5].mxu0 }
 0x2bd   :  { %v368_v46 = vpop.f32.mrb[6].mxu0 }
 0x2be   :  { %v371_v47 = vmax.f32 %v366_v44, 0.0  ;;  %v494_v48 = vpop.f32.mrb[7].mxu0 }
 0x2c0   :  { %v372_v49 = vpack.c.bf16 %v371_v47, %v371_v47 }
 0x2c2   :  { %373 = vst [vmem:[%s633_s3] sm:$0xf] %v372_v49 }
 0x2c3   :  { %378 = vsyncpa [#allocation3], 1 }

</bundles_post_ra>
